<compile_context>
chip_gen: v5e
topology: v5e:2x2
jax: 0.10.0
libtpu: 0.0.40
codegen_flags: <defaults>
</compile_context>

<pallas_src>
import functools

import jax
import jax.numpy as jnp
from jax.experimental import pallas as pl
from jax.experimental.pallas import tpu as pltpu


NEG_SLOPE = 0.01
MAX_BATCH_TILE = 4096  # ~12-16 MiB peak VMEM at this tile (incl. double
                       # buffers) -- fits every generation, incl. v7x (64 MiB).


def _leaky_relu(x):
    # max(x, 0.01*x) == LeakyReLU(0.01) for slope < 1; one fewer VALU op than
    # compare+select.
    return jnp.maximum(x, NEG_SLOPE * x)


def _round_up(x, m):
    return (x + m - 1) // m * m


# -----------------------------------------------------------------------------
# Kernel: 3-layer kinetic MLP + fused block-diagonal output projection,
# all matmuls in bf16 with f32 accumulation.
# -----------------------------------------------------------------------------
def kinetic_model_kernel(
    x_ref,                                           # packed input (TB, in_total)
    w1_ref, b1_ref, w2_ref, b2_ref, w3_ref, b3_ref,  # kinetic MLP hidden layers
    w4f_ref, wsc_ref, bias_ref,                      # fused output-side weights
    out_ref,                                         # (TB, output_dim)
):
    f32 = jnp.float32
    bf16 = jnp.bfloat16

    x = x_ref[...].astype(bf16)  # (TB, input_dim + side_dim), bf16 MXU operand

    # Kinetic MLP hot path: bf16 MXU matmuls (f32 accumulate) + LeakyReLU on VPU.
    # w1 has zero rows for the [waypoints|goal] columns of the packed input,
    # so dot(x, w1) == dot(kinetic_state, W1).
    h = jnp.dot(x, w1_ref[...], preferred_element_type=f32) + b1_ref[...]
    h = _leaky_relu(h).astype(bf16)
    h = jnp.dot(h, w2_ref[...], preferred_element_type=f32) + b2_ref[...]
    h = _leaky_relu(h).astype(bf16)
    h = jnp.dot(h, w3_ref[...], preferred_element_type=f32) + b3_ref[...]
    h = _leaky_relu(h).astype(bf16)

    # Fused output projection: w4 / wwp / wg occupy disjoint column blocks of
    # (w4f, wsc) with zero rows/cols elsewhere, so the sum of these two matmuls
    # plus the fused bias IS the concatenated [kinetic | waypoints | goal].
    out = jnp.dot(h, w4f_ref[...], preferred_element_type=f32)
    out += jnp.dot(x, wsc_ref[...], preferred_element_type=f32)
    out_ref[...] = (out + bias_ref[...]).astype(out_ref.dtype)


# -----------------------------------------------------------------------------
# One-time parameter fusion (NOT on the per-call path).
# -----------------------------------------------------------------------------
def prepare_fused_params(params, input_dim, output_dim, n_waypoints):
    """Fold the weights so the kernel needs only 5 matmuls on a single packed
    input x = [kinetic_state | waypoints | goal]:
      * w1  is zero-row-padded over the side columns of x,
      * w4  / wwp / wg are block-diagonally merged so their outputs land at
        the right offsets of the concatenated output,
    and cast all matmul weights to bf16 (biases stay f32 for the accumulate)."""
    od = output_dim
    nwp = n_waypoints * 2
    side_dim = nwp + 2
    in_total = input_dim + side_dim
    bf16 = jnp.bfloat16

    # Layer 1: only the kinetic_state columns of the packed input contribute.
    w1c = jnp.zeros((in_total, 128), jnp.float32)
    w1c = w1c.at[:input_dim, :].set(params["w1"])

    # Output side: kinetic head -> cols [0, od/2); waypoints -> [od/2, 3od/4);
    # goal -> [3od/4, od).
    w4f = jnp.zeros((128, od), jnp.float32)
    w4f = w4f.at[:, : od // 2].set(params["w4"])

    wsc = jnp.zeros((in_total, od), jnp.float32)
    wsc = wsc.at[input_dim:input_dim + nwp,
                 od // 2: od // 2 + od // 4].set(params["wwp"])
    wsc = wsc.at[input_dim + nwp:, od // 2 + od // 4:].set(params["wg"])

    bias = jnp.zeros((1, od), jnp.float32)
    bias = bias.at[:, : od // 2].set(params["b4"])
    bias = bias.at[:, od // 2: od // 2 + od // 4].set(params["bwp"])
    bias = bias.at[:, od // 2 + od // 4:].set(params["bg"])

    return {
        "w1": w1c.astype(bf16), "b1": params["b1"],
        "w2": params["w2"].astype(bf16), "b2": params["b2"],
        "w3": params["w3"].astype(bf16), "b3": params["b3"],
        "w4f": w4f.astype(bf16), "wsc": wsc.astype(bf16), "bfull": bias,
    }


def _pick_batch_tile(n_envs):
    """>= 2 grid steps whenever batch allows (v7x megacore), sublane-aligned."""
    if n_envs <= 8:
        return n_envs                      # single full block
    tb = _round_up(pl.cdiv(n_envs, 2), 8)  # split batch across >= 2 steps
    return min(tb, MAX_BATCH_TILE)


# -----------------------------------------------------------------------------
# Wrapper
# -----------------------------------------------------------------------------
@functools.partial(jax.jit, static_argnames=("output_dim",))
def kinetic_model_forward(kinetic_state, waypoints, goal, fused, *, output_dim):
    n_envs = kinetic_state.shape[0]

    # Only per-call prep: pack the three inputs side by side (one activation
    # stream -> one DMA pipeline, half the lane-padded VMEM of separate tiles).
    x = jnp.concatenate([kinetic_state, waypoints, goal], axis=-1)
    in_total = x.shape[1]

    tb = _pick_batch_tile(n_envs)
    grid = (pl.cdiv(n_envs, tb),)

    def const_spec(arr):
        # Full-array block, constant index -> stays resident across grid steps.
        return pl.BlockSpec(arr.shape, lambda i: (0, 0))

    args = (
        x,
        fused["w1"], fused["b1"], fused["w2"], fused["b2"],
        fused["w3"], fused["b3"],
        fused["w4f"], fused["wsc"], fused["bfull"],
    )
    in_specs = [pl.BlockSpec((tb, in_total), lambda i: (i, 0))] + [
        const_spec(a) for a in args[1:]
    ]

    # Advisory cost estimate for XLA's scheduler.
    flops = 2 * n_envs * (
        in_total * 128 + 128 * 256 + 256 * 128
        + 128 * output_dim + in_total * output_dim
    )
    weight_bytes = sum(int(a.size) * a.dtype.itemsize for a in args[1:])
    bytes_accessed = weight_bytes + 4 * n_envs * (in_total + output_dim)

    # Output is written directly at (n_envs, output_dim): no post-kernel slice
    # pass; a sub-128-lane masked store is cheaper than an extra HBM copy.
    return pl.pallas_call(
        kinetic_model_kernel,
        out_shape=jax.ShapeDtypeStruct((n_envs, output_dim), jnp.float32),
        grid=grid,
        in_specs=in_specs,
        out_specs=pl.BlockSpec((tb, output_dim), lambda i: (i, 0)),
        compiler_params=pltpu.CompilerParams(
            dimension_semantics=("parallel",),
            vmem_limit_bytes=48 * 1024 * 1024,
        ),
        cost_estimate=pl.CostEstimate(
            flops=flops, transcendentals=0, bytes_accessed=bytes_accessed
        ),
    )(*args)


# -----------------------------------------------------------------------------
# Synthetic parameters (PyTorch-Linear shapes, stored (in_features, out_features))
# and pure-JAX f32 reference.
# -----------------------------------------------------------------------------
def init_params(key, input_dim, output_dim, n_waypoints):
    dims = {
        "1": (input_dim, 128),
        "2": (128, 256),
        "3": (256, 128),
        "4": (128, output_dim // 2),
        "wp": (n_waypoints * 2, output_dim // 4),
        "g": (2, output_dim // 4),
    }
    params = {}
    for name, (din, dout) in dims.items():
        key, kw, kb = jax.random.split(key, 3)
        bound = 1.0 / (din ** 0.5)
        params["w" + name] = jax.random.uniform(
            kw, (din, dout), jnp.float32, minval=-bound, maxval=bound)
        params["b" + name] = jax.random.uniform(
            kb, (1, dout), jnp.float32, minval=-bound, maxval=bound)
    return params


def reference_forward(kinetic_state, waypoints, goal, params):
    def lrelu(v):
        return jnp.where(v > 0, v, NEG_SLOPE * v)
    h = lrelu(kinetic_state @ params["w1"] + params["b1"])
    h = lrelu(h @ params["w2"] + params["b2"])
    h = lrelu(h @ params["w3"] + params["b3"])
    kin = h @ params["w4"] + params["b4"]
    wp = waypoints @ params["wwp"] + params["bwp"]
    gl = goal @ params["wg"] + params["bg"]
    return jnp.concatenate([kin, wp, gl], axis=-1)


if __name__ == "__main__":
    # Small shapes consistent with the module's forward.
    n_envs = 8
    input_dim = 16
    output_dim = 64          # must be divisible by 4
    n_waypoints = 8          # -> waypoints feature dim = 16

    key = jax.random.PRNGKey(0)
    key, k1, k2, k3 = jax.random.split(key, 4)

    kinetic_state = jax.random.normal(k1, (n_envs, input_dim), jnp.float32)
    waypoints = jax.random.normal(k2, (n_envs, n_waypoints * 2), jnp.float32)
    goal = jax.random.normal(k3, (n_envs, 2), jnp.float32)

    params = init_params(key, input_dim, output_dim, n_waypoints)
    fused = prepare_fused_params(params, input_dim, output_dim, n_waypoints)

    out = kinetic_model_forward(
        kinetic_state, waypoints, goal, fused, output_dim=output_dim)
    out = jax.block_until_ready(out)

    ref = reference_forward(kinetic_state, waypoints, goal, params)
    assert out.shape == (n_envs, output_dim), out.shape
    # bf16 MXU path vs f32 reference -> relaxed tolerance.
    assert jnp.allclose(out, ref, atol=5e-2, rtol=5e-2), (
        "mismatch vs reference; max abs err = "
        f"{float(jnp.max(jnp.abs(out - ref)))}")

    print("KERNEL_OK")
</pallas_src>

<mosaic_0001>
module attributes {stable_mosaic.version = 11 : i64} {
  func.func @kinetic_model_kernel(%arg0: i32, %arg1: memref<8x34xf32, #tpu.memory_space<vmem>>, %arg2: memref<34x128xbf16, #tpu.memory_space<vmem>>, %arg3: memref<1x128xf32, #tpu.memory_space<vmem>>, %arg4: memref<128x256xbf16, #tpu.memory_space<vmem>>, %arg5: memref<1x256xf32, #tpu.memory_space<vmem>>, %arg6: memref<256x128xbf16, #tpu.memory_space<vmem>>, %arg7: memref<1x128xf32, #tpu.memory_space<vmem>>, %arg8: memref<128x64xbf16, #tpu.memory_space<vmem>>, %arg9: memref<34x64xbf16, #tpu.memory_space<vmem>>, %arg10: memref<1x64xf32, #tpu.memory_space<vmem>>, %arg11: memref<8x64xf32, #tpu.memory_space<vmem>>) attributes {dimension_semantics = [#tpu.dimension_semantics<parallel>], iteration_bounds = array<i64: 1>, scalar_prefetch = 0 : i64, scratch_operands = 0 : i64, tpu.core_type = #tpu.core_type<tc>, window_params = [{transform_indices = @transform_0, window_bounds = array<i64: 8, 34>}, {pipeline_mode = #tpu.pipeline_mode<synchronous>, transform_indices = @transform_1, window_bounds = array<i64: 34, 128>}, {pipeline_mode = #tpu.pipeline_mode<synchronous>, transform_indices = @transform_2, window_bounds = array<i64: 1, 128>}, {pipeline_mode = #tpu.pipeline_mode<synchronous>, transform_indices = @transform_3, window_bounds = array<i64: 128, 256>}, {pipeline_mode = #tpu.pipeline_mode<synchronous>, transform_indices = @transform_4, window_bounds = array<i64: 1, 256>}, {pipeline_mode = #tpu.pipeline_mode<synchronous>, transform_indices = @transform_5, window_bounds = array<i64: 256, 128>}, {pipeline_mode = #tpu.pipeline_mode<synchronous>, transform_indices = @transform_6, window_bounds = array<i64: 1, 128>}, {pipeline_mode = #tpu.pipeline_mode<synchronous>, transform_indices = @transform_7, window_bounds = array<i64: 128, 64>}, {pipeline_mode = #tpu.pipeline_mode<synchronous>, transform_indices = @transform_8, window_bounds = array<i64: 34, 64>}, {pipeline_mode = #tpu.pipeline_mode<synchronous>, transform_indices = @transform_9, window_bounds = array<i64: 1, 64>}, {transform_indices = @transform_10, window_bounds = array<i64: 8, 64>}]} {
    %c0 = arith.constant 0 : index
    %c0_0 = arith.constant 0 : index
    %0 = vector.load %arg1[%c0, %c0_0] : memref<8x34xf32, #tpu.memory_space<vmem>>, vector<8x34xf32>
    %1 = arith.truncf %0 : vector<8x34xf32> to vector<8x34xbf16>
    %c0_1 = arith.constant 0 : index
    %c0_2 = arith.constant 0 : index
    %2 = vector.load %arg2[%c0_1, %c0_2] : memref<34x128xbf16, #tpu.memory_space<vmem>>, vector<34x128xbf16>
    %cst = arith.constant dense<0.000000e+00> : vector<8x128xf32>
    %3 = tpu.matmul %1, %2, %cst {dimension_numbers = #tpu.dot_dimension_numbers<[1], [0], [0], [1], [0, 0, 1, 1], [], []>} : vector<8x34xbf16>, vector<34x128xbf16>, vector<8x128xf32> -> vector<8x128xf32>
    %c0_3 = arith.constant 0 : index
    %c0_4 = arith.constant 0 : index
    %4 = vector.load %arg3[%c0_3, %c0_4] : memref<1x128xf32, #tpu.memory_space<vmem>>, vector<1x128xf32>
    %5 = vector.broadcast %4 : vector<1x128xf32> to vector<8x128xf32>
    %6 = arith.addf %3, %5 : vector<8x128xf32>
    %cst_5 = arith.constant 0.00999999977 : f32
    %7 = vector.broadcast %cst_5 : f32 to vector<8x128xf32>
    %8 = arith.mulf %7, %6 : vector<8x128xf32>
    %9 = arith.maximumf %6, %8 : vector<8x128xf32>
    %10 = arith.truncf %9 : vector<8x128xf32> to vector<8x128xbf16>
    %c0_6 = arith.constant 0 : index
    %c0_7 = arith.constant 0 : index
    %11 = vector.load %arg4[%c0_6, %c0_7] : memref<128x256xbf16, #tpu.memory_space<vmem>>, vector<128x256xbf16>
    %cst_8 = arith.constant dense<0.000000e+00> : vector<8x256xf32>
    %12 = tpu.matmul %10, %11, %cst_8 {dimension_numbers = #tpu.dot_dimension_numbers<[1], [0], [0], [1], [0, 0, 1, 1], [], []>} : vector<8x128xbf16>, vector<128x256xbf16>, vector<8x256xf32> -> vector<8x256xf32>
    %c0_9 = arith.constant 0 : index
    %c0_10 = arith.constant 0 : index
    %13 = vector.load %arg5[%c0_9, %c0_10] : memref<1x256xf32, #tpu.memory_space<vmem>>, vector<1x256xf32>
    %14 = vector.broadcast %13 : vector<1x256xf32> to vector<8x256xf32>
    %15 = arith.addf %12, %14 : vector<8x256xf32>
    %cst_11 = arith.constant 0.00999999977 : f32
    %16 = vector.broadcast %cst_11 : f32 to vector<8x256xf32>
    %17 = arith.mulf %16, %15 : vector<8x256xf32>
    %18 = arith.maximumf %15, %17 : vector<8x256xf32>
    %19 = arith.truncf %18 : vector<8x256xf32> to vector<8x256xbf16>
    %c0_12 = arith.constant 0 : index
    %c0_13 = arith.constant 0 : index
    %20 = vector.load %arg6[%c0_12, %c0_13] : memref<256x128xbf16, #tpu.memory_space<vmem>>, vector<256x128xbf16>
    %cst_14 = arith.constant dense<0.000000e+00> : vector<8x128xf32>
    %21 = tpu.matmul %19, %20, %cst_14 {dimension_numbers = #tpu.dot_dimension_numbers<[1], [0], [0], [1], [0, 0, 1, 1], [], []>} : vector<8x256xbf16>, vector<256x128xbf16>, vector<8x128xf32> -> vector<8x128xf32>
    %c0_15 = arith.constant 0 : index
    %c0_16 = arith.constant 0 : index
    %22 = vector.load %arg7[%c0_15, %c0_16] : memref<1x128xf32, #tpu.memory_space<vmem>>, vector<1x128xf32>
    %23 = vector.broadcast %22 : vector<1x128xf32> to vector<8x128xf32>
    %24 = arith.addf %21, %23 : vector<8x128xf32>
    %cst_17 = arith.constant 0.00999999977 : f32
    %25 = vector.broadcast %cst_17 : f32 to vector<8x128xf32>
    %26 = arith.mulf %25, %24 : vector<8x128xf32>
    %27 = arith.maximumf %24, %26 : vector<8x128xf32>
    %28 = arith.truncf %27 : vector<8x128xf32> to vector<8x128xbf16>
    %c0_18 = arith.constant 0 : index
    %c0_19 = arith.constant 0 : index
    %29 = vector.load %arg8[%c0_18, %c0_19] : memref<128x64xbf16, #tpu.memory_space<vmem>>, vector<128x64xbf16>
    %cst_20 = arith.constant dense<0.000000e+00> : vector<8x64xf32>
    %30 = tpu.matmul %28, %29, %cst_20 {dimension_numbers = #tpu.dot_dimension_numbers<[1], [0], [0], [1], [0, 0, 1, 1], [], []>} : vector<8x128xbf16>, vector<128x64xbf16>, vector<8x64xf32> -> vector<8x64xf32>
    %c0_21 = arith.constant 0 : index
    %c0_22 = arith.constant 0 : index
    %31 = vector.load %arg9[%c0_21, %c0_22] : memref<34x64xbf16, #tpu.memory_space<vmem>>, vector<34x64xbf16>
    %cst_23 = arith.constant dense<0.000000e+00> : vector<8x64xf32>
    %32 = tpu.matmul %1, %31, %cst_23 {dimension_numbers = #tpu.dot_dimension_numbers<[1], [0], [0], [1], [0, 0, 1, 1], [], []>} : vector<8x34xbf16>, vector<34x64xbf16>, vector<8x64xf32> -> vector<8x64xf32>
    %33 = arith.addf %30, %32 : vector<8x64xf32>
    %c0_24 = arith.constant 0 : index
    %c0_25 = arith.constant 0 : index
    %34 = vector.load %arg10[%c0_24, %c0_25] : memref<1x64xf32, #tpu.memory_space<vmem>>, vector<1x64xf32>
    %35 = vector.broadcast %34 : vector<1x64xf32> to vector<8x64xf32>
    %36 = arith.addf %33, %35 : vector<8x64xf32>
    %c0_26 = arith.constant 0 : index
    %c0_27 = arith.constant 0 : index
    %37 = vector.load %arg11[%c0_26, %c0_27] : memref<8x64xf32, #tpu.memory_space<vmem>>, vector<8x64xf32>
    tpu.vector_store %arg11[%c0_26, %c0_27], %36 {strides = array<i32>} : memref<8x64xf32, #tpu.memory_space<vmem>>, vector<8x64xf32>,
    return
  }
  func.func @transform_0(%arg0: i32) -> (i32, i32) {
    %c0_i32 = arith.constant 0 : i32
    %c0_i32_0 = arith.constant 0 : i32
    return %arg0, %c0_i32 : i32, i32
  }
  func.func @transform_1(%arg0: i32) -> (i32, i32) {
    %c0_i32 = arith.constant 0 : i32
    %c0_i32_0 = arith.constant 0 : i32
    %c0_i32_1 = arith.constant 0 : i32
    return %c0_i32, %c0_i32_0 : i32, i32
  }
  func.func @transform_2(%arg0: i32) -> (i32, i32) {
    %c0_i32 = arith.constant 0 : i32
    %c0_i32_0 = arith.constant 0 : i32
    %c0_i32_1 = arith.constant 0 : i32
    return %c0_i32, %c0_i32_0 : i32, i32
  }
  func.func @transform_3(%arg0: i32) -> (i32, i32) {
    %c0_i32 = arith.constant 0 : i32
    %c0_i32_0 = arith.constant 0 : i32
    %c0_i32_1 = arith.constant 0 : i32
    return %c0_i32, %c0_i32_0 : i32, i32
  }
  func.func @transform_4(%arg0: i32) -> (i32, i32) {
    %c0_i32 = arith.constant 0 : i32
    %c0_i32_0 = arith.constant 0 : i32
    %c0_i32_1 = arith.constant 0 : i32
    return %c0_i32, %c0_i32_0 : i32, i32
  }
  func.func @transform_5(%arg0: i32) -> (i32, i32) {
    %c0_i32 = arith.constant 0 : i32
    %c0_i32_0 = arith.constant 0 : i32
    %c0_i32_1 = arith.constant 0 : i32
    return %c0_i32, %c0_i32_0 : i32, i32
  }
  func.func @transform_6(%arg0: i32) -> (i32, i32) {
    %c0_i32 = arith.constant 0 : i32
    %c0_i32_0 = arith.constant 0 : i32
    %c0_i32_1 = arith.constant 0 : i32
    return %c0_i32, %c0_i32_0 : i32, i32
  }
  func.func @transform_7(%arg0: i32) -> (i32, i32) {
    %c0_i32 = arith.constant 0 : i32
    %c0_i32_0 = arith.constant 0 : i32
    %c0_i32_1 = arith.constant 0 : i32
    return %c0_i32, %c0_i32_0 : i32, i32
  }
  func.func @transform_8(%arg0: i32) -> (i32, i32) {
    %c0_i32 = arith.constant 0 : i32
    %c0_i32_0 = arith.constant 0 : i32
    %c0_i32_1 = arith.constant 0 : i32
    return %c0_i32, %c0_i32_0 : i32, i32
  }
  func.func @transform_9(%arg0: i32) -> (i32, i32) {
    %c0_i32 = arith.constant 0 : i32
    %c0_i32_0 = arith.constant 0 : i32
    %c0_i32_1 = arith.constant 0 : i32
    return %c0_i32, %c0_i32_0 : i32, i32
  }
  func.func @transform_10(%arg0: i32) -> (i32, i32) {
    %c0_i32 = arith.constant 0 : i32
    %c0_i32_0 = arith.constant 0 : i32
    return %arg0, %c0_i32 : i32, i32
  }
}

</mosaic_0001>

<bundles_post_ra>
// kernel: kinetic_model_forward.1
= control target key start
LH: loop header
LB: loop body
LE: loop exit
PB: predicated region body
PF: predicated region fallthrough
CT: control target
= control target key end

     0   :  { %15 = vsyncpa [#allocation3], 0  ;;  %s1116_s0 = inlined_call_operand.vmem [shape: f32[8,34], index: 0, kind: input, shape index: {}]   ;;  %s1117_s1 = inlined_call_operand.hbm [shape: bf16[34,128], index: 1, kind: input, shape index: {}]   ;;  %s1118_s2 = inlined_call_operand.vmem [shape: f32[1,128], index: 2, kind: input, shape index: {}]   ;;  %s1119_s3 = inlined_call_operand.vmem [shape: bf16[128,256], index: 3, kind: input, shape index: {}]   ;;  %s1120_s4 = inlined_call_operand.vmem [shape: f32[1,256], index: 4, kind: input, shape index: {}]   ;;  %s1121_s5 = inlined_call_operand.hbm [shape: bf16[256,128], index: 5, kind: input, shape index: {}]   ;;  %s1122_s6 = inlined_call_operand.vmem [shape: f32[1,128], index: 6, kind: input, shape index: {}]   ;;  %s1123_s7 = inlined_call_operand.vmem [shape: bf16[128,64], index: 7, kind: input, shape index: {}]   ;;  %s1124_s8 = inlined_call_operand.hbm [shape: bf16[34,64], index: 8, kind: input, shape index: {}]   ;;  %s1125_s9 = inlined_call_operand.vmem [shape: f32[1,64], index: 9, kind: input, shape index: {}]   ;;  %s1126_s10 = inlined_call_operand.hbm [shape: f32[8,64], index: 10, kind: output, shape index: {}]  }
   0x1   :  { %16 = vsyncpa [#allocation6], 0 }
   0x2   :  { %17 = vsyncpa [#allocation4], 0  ;;  %s43_s15 = sshll.u32 %s1121_s5, 4  ;;  %s900_s16 = smov [#allocation5]   ;;  %s44_s15 = int_to_ptr.hbm [resolvable:$true] %s43_s15 }
   0x3   :  { %s45_s17 = sshll.u32 %s900_s16, 4  ;;  %s24_s20 = sshll.u32 %s1117_s1, 4  ;;  %s46_s17 = int_to_ptr.vmem [resolvable:$true] %s45_s17  ;;  %s25_s20 = int_to_ptr.hbm [resolvable:$true] %s24_s20 }
   0x4   :  { %s901_s21 = smov 64   ;;  %s902_s22 = smov 4  }
   0x5   :  { %51 = dma.hbm_to_vmem [thread:$0]  %s44_s15, 2048, %s46_s17, [#allocation6], %s901_s21, %s901_s21, %s902_s22  }
   0x6   :  { %s903_s23 = smov [#allocation2]   ;;  %s60_s27 = sshll.u32 %s1124_s8, 4  ;;  %s61_s27 = int_to_ptr.hbm [resolvable:$true] %s60_s27 }
   0x7   :  { %s26_s24 = sshll.u32 %s903_s23, 4  ;;  %s904_s5 = smov [#allocation7]   ;;  %s27_s24 = int_to_ptr.vmem [resolvable:$true] %s26_s24 }
   0x8   :  { %32 = dma.hbm_to_vmem [thread:$0]  %s25_s20, 320, %s27_s24, [#allocation3], %s901_s21, %s901_s21, %s902_s22  }
   0x9   :  { %s62_s28 = sshll.u32 %s904_s5, 4  ;;  %s63_s28 = int_to_ptr.vmem [resolvable:$true] %s62_s28 }
   0xa   :  { %68 = dma.hbm_to_vmem [thread:$0]  %s61_s27, 320, %s63_s28, [#allocation6], %s901_s21, %s901_s21, %s902_s22  }
   0xb   :  { %894 = dma.done.wait [#allocation3], 320  }
   0xc   :  { %895 = vsyncadd [#allocation3], 4294966976 }
   0xd   :  { %896 = dma.done.wait [#allocation6], 2368  }
   0xe   :  { %897 = vsyncadd [#allocation6], 4294964928  ;;  %v90_v0 = vld [vmem:[#allocation2 + $0x10] sm:$0x1]  ;;  %vm114_vm0 = vcmask 1040384   ;;  %v746_v18 = vld [vmem:[#allocation2 + $0x8] sm:$0xff] }
   0xf   :  { %v104_v1 = vunpack.c.l.b16 %v90_v0  ;;  %v634_v2 = vld [vmem:[%s1119_s3 + $0x70] sm:$0xf]  ;;  %v762_v3 = vld [vmem:[%s1119_s3 + $0x74] sm:$0xf0]  ;;  %v761_v5 = vld [vmem:[%s1119_s3 + $0x74] sm:$0xf] }
  0x10   :  { %v635_v4 = vor.u32 %v762_v3, %v634_v2  ;;  %v636_v6 = vld [vmem:[%s1119_s3 + $0x78] sm:$0xf0]  ;;  %v626_v7 = vld [vmem:[%s1119_s3 + $0x60] sm:$0xf]  ;;  %v760_v10 = vld [vmem:[%s1119_s3 + $0x64] sm:$0xf0] }
  0x11   :  { %v107_v8 = vpack.c.b16 %v104_v1, %v104_v1  ;;  %v639_v9 = vor.u32 %v761_v5, %v636_v6  ;;  %v759_v11 = vld [vmem:[%s1119_s3 + $0x64] sm:$0xf]  ;;  %v628_v12 = vld [vmem:[%s1119_s3 + $0x68] sm:$0xf0]  ;;  %v627_v13 = vor.u32 %v760_v10, %v626_v7  ;;  %v618_v16 = vld [vmem:[%s1119_s3 + $0x50] sm:$0xf] }
  0x12   :  { %236 = vmatpush.bf16.msra.mxu1 %v635_v4  ;;  %v631_v15 = vor.u32 %v759_v11, %v628_v12  ;;  %v758_v17 = vld [vmem:[%s1119_s3 + $0x54] sm:$0xf0]  ;;  %v757_v19 = vld [vmem:[%s1119_s3 + $0x54] sm:$0xf]  ;;  %v620_v20 = vld [vmem:[%s1119_s3 + $0x58] sm:$0xf0] }
  0x13   :  { %v116_v14 = vsel %vm114_vm0, %v107_v8, 0  ;;  %249 = vmatpush.bf16.msra.mxu2 %v639_v9  ;;  %v745_v21 = vld [vmem:[#allocation2] sm:$0xff]  ;;  %v619_v23 = vor.u32 %v758_v17, %v618_v16  ;;  %v623_v25 = vor.u32 %v757_v19, %v620_v20  ;;  %v756_v26 = vld [vmem:[%s1119_s3 + $0x44] sm:$0xf0]  ;;  %v612_v28 = vld [vmem:[%s1119_s3 + $0x48] sm:$0xf0] }
  0x14   :  { %123 = vmatpush.bf16.msra.mxu0 %v116_v14  ;;  %v84_v22 = vld [vmem:[%s1116_s0] sm:$0xff]  ;;  %v602_v32 = vld [vmem:[%s1119_s3 + $0x30] sm:$0xf]  ;;  %v754_v33 = vld [vmem:[%s1119_s3 + $0x34] sm:$0xf0]  ;;  %vm110_vm1 = vcmask 277504  }
  0x15   :  { %v610_v24 = vld [vmem:[%s1119_s3 + $0x40] sm:$0xf]  ;;  %v755_v27 = vld [vmem:[%s1119_s3 + $0x44] sm:$0xf]  ;;  %v1022_v30 = vpack.c.bf16 %v84_v22, %v84_v22  ;;  %v753_v34 = vld [vmem:[%s1119_s3 + $0x34] sm:$0xf]  ;;  %v603_v36 = vor.u32 %v754_v33, %v602_v32 }
  0x16   :  { %237 = vmatpush.bf16.msra.mxu1 %v627_v13  ;;  %v611_v29 = vor.u32 %v756_v26, %v610_v24  ;;  %v615_v31 = vor.u32 %v755_v27, %v612_v28  ;;  %v604_v35 = vld [vmem:[%s1119_s3 + $0x38] sm:$0xf0]  ;;  %v594_v38 = vld [vmem:[%s1119_s3 + $0x20] sm:$0xf]  ;;  %v752_v39 = vld [vmem:[%s1119_s3 + $0x24] sm:$0xf0] }
  0x17   :  { %250 = vmatpush.bf16.msra.mxu2 %v631_v15  ;;  %v607_v37 = vor.u32 %v753_v34, %v604_v35  ;;  %v751_v40 = vld [vmem:[%s1119_s3 + $0x24] sm:$0xf]  ;;  %v596_v41 = vld [vmem:[%s1119_s3 + $0x28] sm:$0xf0]  ;;  %v595_v42 = vor.u32 %v752_v39, %v594_v38  ;;  %v586_v44 = vld [vmem:[%s1119_s3 + $0x10] sm:$0xf] }
  0x18   :  { %124 = vmatpush.bf16.msra.mxu0 %v746_v18  ;;  %v599_v43 = vor.u32 %v751_v40, %v596_v41  ;;  %v750_v45 = vld [vmem:[%s1119_s3 + $0x14] sm:$0xf0]  ;;  %v749_v46 = vld [vmem:[%s1119_s3 + $0x14] sm:$0xf]  ;;  %v588_v48 = vld [vmem:[%s1119_s3 + $0x18] sm:$0xf0] }
  0x19   :  { %v587_v47 = vor.u32 %v750_v45, %v586_v44  ;;  %v591_v49 = vor.u32 %v749_v46, %v588_v48  ;;  %v578_v50 = vld [vmem:[%s1119_s3] sm:$0xf]  ;;  %v748_v51 = vld [vmem:[%s1119_s3 + $0x4] sm:$0xf0]  ;;  %v747_v52 = vld [vmem:[%s1119_s3 + $0x4] sm:$0xf] }
  0x1a   :  { %238 = vmatpush.bf16.msra.mxu1 %v619_v23  ;;  %v579_v53 = vor.u32 %v748_v51, %v578_v50  ;;  %v580_v54 = vld [vmem:[%s1119_s3 + $0x8] sm:$0xf0]  ;;  %v769_v58 = vld [vmem:[#allocation5 + $0x30] sm:$0xff]  ;;  %v768_v60 = vld [vmem:[#allocation5 + $0x28] sm:$0xff]  ;;  %s905_s21 = smov [#allocation8]   ;;  %s556_s24 = sshll.u32 %s1126_s10, 4  ;;  %s557_s24 = int_to_ptr.hbm [resolvable:$true] %s556_s24 }
  0x1b   :  { %251 = vmatpush.bf16.msra.mxu2 %v623_v25  ;;  %v583_v55 = vor.u32 %v747_v52, %v580_v54  ;;  %v770_v56 = vld [vmem:[#allocation5 + $0x38] sm:$0xff]  ;;  %v777_v59 = vld [vmem:[#allocation5 + $0x70] sm:$0xff]  ;;  %v776_v61 = vld [vmem:[#allocation5 + $0x68] sm:$0xff]  ;;  %s554_s22 = sshll.u32 %s905_s21, 4  ;;  %vm547_vm2 = vcmask 523264   ;;  %s555_s22 = int_to_ptr.vmem [resolvable:$true] %s554_s22 }
  0x1c   :  { %125 = vmatpush.bf16.msra.mxu0 %v745_v21  ;;  %v778_v57 = vld [vmem:[#allocation5 + $0x78] sm:$0xff]  ;;  %400 = vmatpush.bf16.msra.mxu3 %v770_v56  ;;  %v767_v62 = vld [vmem:[#allocation5 + $0x20] sm:$0xff]  ;;  %v765_v1 = vld [vmem:[#allocation5 + $0x10] sm:$0xff] }
  0x1d   :  { %v775_v63 = vld [vmem:[#allocation5 + $0x60] sm:$0xff]  ;;  %v766_v0 = vld [vmem:[#allocation5 + $0x18] sm:$0xff]  ;;  %v795_v2 = vld [vmem:[%s1118_s2] ss:$0 sm:$0xff] }
  0x1e   :  { %239 = vmatpush.bf16.msra.mxu1 %v611_v29  ;;  %v774_v9 = vld [vmem:[#allocation5 + $0x58] sm:$0xff]  ;;  %v764_v10 = vld [vmem:[#allocation5 + $0x8] sm:$0xff]  ;;  %v773_v11 = vld [vmem:[#allocation5 + $0x50] sm:$0xff] }
  0x1f   :  { %575 = vmatmul.msk.bf16.vlgmr.msra.gmra.mxu0 %vm110_vm1, %v1022_v30  ;;  %252 = vmatpush.bf16.msra.mxu2 %v615_v31  ;;  %v763_v12 = vld [vmem:[#allocation5] sm:$0xff]  ;;  %v772_v13 = vld [vmem:[#allocation5 + $0x48] sm:$0xff]  ;;  %v449_v16 = vld [vmem:[#allocation7 + $0x10] sm:$0x1] }
  0x20   :  { %413 = vmatpush.bf16.msrb.mxu0 %v778_v57  ;;  %401 = vmatpush.bf16.msra.mxu3 %v769_v58  ;;  %v771_v14 = vld [vmem:[#allocation5 + $0x40] sm:$0xff]  ;;  %v459_v18 = vunpack.c.l.b16 %v449_v16  ;;  %v784_v20 = vld [vmem:[%s1123_s7 + $0x28] sm:$0xff]  ;;  %v783_v22 = vld [vmem:[%s1123_s7 + $0x20] sm:$0xff] }
  0x21   :  { %v786_v15 = vld [vmem:[%s1123_s7 + $0x38] sm:$0xff]  ;;  %v785_v17 = vld [vmem:[%s1123_s7 + $0x30] sm:$0xff]  ;;  %v150_v23 = vld [vmem:[%s1120_s4] sm:$0x3] }
  0x22   :  { %240 = vmatpush.bf16.msra.mxu1 %v603_v36  ;;  %v462_v19 = vpack.c.b16 %v459_v18, %v459_v18  ;;  %v152_v24 = vperm.slane %v150_v23, 0  ;;  %v782_v25 = vld [vmem:[%s1123_s7 + $0x18] sm:$0xff]  ;;  %v153_v29 = vperm.slane %v150_v23, 1  ;;  %v781_v40 = vld [vmem:[%s1123_s7 + $0x10] sm:$0xff]  ;;  %v779_v44 = vld [vmem:[%s1123_s7] sm:$0xff] }
  0x23   :  { %253 = vmatpush.bf16.msra.mxu2 %v607_v37  ;;  %v788_v41 = vld [vmem:[#allocation7 + $0x8] sm:$0xff] }
  0x24   :  { %414 = vmatpush.bf16.msrb.mxu0 %v777_v59  ;;  %402 = vmatpush.bf16.msra.mxu3 %v768_v60  ;;  %v466_v21 = vsel %vm114_vm0, %v462_v19, 0  ;;  %v796_v45 = vld [vmem:[%s1122_s6] ss:$0 sm:$0xff] }
  0x26   :  { %241 = vmatpush.bf16.msra.mxu1 %v595_v42  ;;  %v780_v42 = vld [vmem:[%s1123_s7 + $0x8] sm:$0xff] }
  0x27   :  { %254 = vmatpush.bf16.msra.mxu2 %v599_v43  ;;  %v787_v43 = vld [vmem:[#allocation7] sm:$0xff] }
  0x28   :  { %415 = vmatpush.bf16.msrb.mxu0 %v776_v61  ;;  %403 = vmatpush.bf16.msra.mxu3 %v767_v62 }
  0x2a   :  { %242 = vmatpush.bf16.msra.mxu1 %v587_v47 }
  0x2b   :  { %255 = vmatpush.bf16.msra.mxu2 %v591_v49 }
  0x2c   :  { %416 = vmatpush.bf16.msrb.mxu0 %v775_v63  ;;  %404 = vmatpush.bf16.msra.mxu3 %v766_v0 }
  0x2e   :  { %243 = vmatpush.bf16.msra.mxu1 %v579_v53 }
  0x2f   :  { %256 = vmatpush.bf16.msra.mxu2 %v583_v55 }
  0x30   :  { %405 = vmatpush.bf16.msra.mxu3 %v765_v1  ;;  %417 = vmatpush.bf16.msrb.mxu0 %v774_v9 }
  0x32   :  { %473 = vmatpush.bf16.msrb.mxu1 %v466_v21 }
  0x33   :  { %529 = vmatpush.bf16.msrb.mxu2 %v786_v15 }
  0x34   :  { %406 = vmatpush.bf16.msra.mxu3 %v764_v10  ;;  %418 = vmatpush.bf16.msrb.mxu0 %v773_v11 }
  0x36   :  { %474 = vmatpush.bf16.msrb.mxu1 %v788_v41 }
  0x37   :  { %530 = vmatpush.bf16.msrb.mxu2 %v785_v17 }
  0x38   :  { %407 = vmatpush.bf16.msra.mxu3 %v763_v12  ;;  %419 = vmatpush.bf16.msrb.mxu0 %v772_v13 }
  0x3a   :  { %475 = vmatpush.bf16.msrb.mxu1 %v787_v43 }
  0x3b   :  { %531 = vmatpush.bf16.msrb.mxu2 %v784_v20 }
  0x3c   :  { %420 = vmatpush.bf16.msrb.mxu0 %v771_v14 }
  0x3f   :  { %532 = vmatpush.bf16.msrb.mxu2 %v783_v22 }
  0x43   :  { %533 = vmatpush.bf16.msrb.mxu2 %v782_v25 }
  0x47   :  { %534 = vmatpush.bf16.msrb.mxu2 %v781_v40 }
  0x4b   :  { %535 = vmatpush.bf16.msrb.mxu2 %v780_v42 }
  0x4f   :  { %536 = vmatpush.bf16.msrb.mxu2 %v779_v44 }
  0x9c   :  { %v127_v3 = vpop.f32.mrf.mxu0 }
  0x9d   :  { %v128_v4 = vadd.f32 %v795_v2, %v127_v3 }
  0x9f   :  { %v131_v5 = vmul.f32 0.01, %v128_v4 }
  0xa1   :  { %v132_v6 = vmax.f32 %v128_v4, %v131_v5 }
  0xa3   :  { %v133_v7 = vpack.c.bf16 %v132_v6, %v132_v6 }
  0xa4   :  { %v129_v8 = vpop.f32.mrf.mxu0 }
  0xa5   :  { %244 = vmatmul.bf16.vlgmr.msra.gmra.mxu1 %v133_v7  ;;  %257 = vmatmul.bf16.vlgmr.msra.gmra.mxu2 %v133_v7 }
  0xb5   :  { %712 = vmatmul.msk.bf16.vlgmr.msrb.gmra.mxu1 %vm110_vm1, %v1022_v30  ;;  %v797_v30 = vld [vmem:[%s1125_s9] ss:$0 sm:$0xff] }
 0x122   :  { %v245_v26 = vpop.f32.mrf.mxu1 }
 0x123   :  { %v246_v27 = vadd.f32 %v245_v26, %v152_v24 }
 0x125   :  { %v262_v28 = vmul.f32 0.01, %v246_v27 }
 0x127   :  { %v264_v31 = vmax.f32 %v246_v27, %v262_v28 }
 0x128   :  { %v258_v32 = vpop.f32.mrf.mxu2 }
 0x129   :  { %v259_v33 = vadd.f32 %v258_v32, %v153_v29  ;;  %v266_v34 = vpack.c.bf16 %v264_v31, %v264_v31 }
 0x12a   :  { %v247_v35 = vpop.f32.mrf.mxu1 }
 0x12b   :  { %v263_v36 = vmul.f32 0.01, %v259_v33  ;;  %408 = vmatmul.bf16.vlgmr.msra.gmra.mxu3 %v266_v34 }
 0x12d   :  { %v265_v37 = vmax.f32 %v259_v33, %v263_v36 }
 0x12f   :  { %v267_v38 = vpack.c.bf16 %v265_v37, %v265_v37 }
 0x130   :  { %v260_v39 = vpop.f32.mrf.mxu2 }
 0x131   :  { %421 = vmatmul.bf16.vlgmr.msrb.gmra.mxu0 %v267_v38 }
 0x132   :  { %v477_v55 = vpop.f32.mrf.mxu1 }
 0x13a   :  { %v479_v56 = vpop.f32.mrf.mxu1 }
 0x1ae   :  { %v409_v46 = vpop.f32.mrf.mxu3  ;;  %v422_v47 = vpop.f32.mrf.mxu0 }
 0x1af   :  { %v410_v48 = vadd.f32 %v796_v45, %v409_v46 }
 0x1b1   :  { %v423_v49 = vadd.f32 %v422_v47, %v410_v48 }
 0x1b3   :  { %v426_v50 = vmul.f32 0.01, %v423_v49 }
 0x1b5   :  { %v427_v51 = vmax.f32 %v423_v49, %v426_v50 }
 0x1b6   :  { %v411_v52 = vpop.f32.mrf.mxu3  ;;  %v424_v53 = vpop.f32.mrf.mxu0 }
 0x1b7   :  { %v428_v54 = vpack.c.bf16 %v427_v51, %v427_v51 }
 0x1b9   :  { %537 = vmatmul.bf16.vlgmr.msrb.gmra.mxu2 %v428_v54 }
 0x23c   :  { %v538_v57 = vpop.f32.mrf.mxu2 }
 0x23d   :  { %v539_v58 = vadd.f32 %v538_v57, %v477_v55 }
 0x23f   :  { %v546_v59 = vadd.f32 %v797_v30, %v539_v58 }
 0x241   :  { %548 = vst.msk [vmem:[#allocation8] sm:$0xff] %vm547_vm2, %v546_v59 }
 0x242   :  { %559 = dma.vmem_to_hbm [thread:$0]  %s555_s22, 128, %s557_s24, [#allocation4]  }
 0x244   :  { %v540_v60 = vpop.f32.mrf.mxu2 }
 0x245   :  { %898 = dma.done.wait [#allocation4], 128  }
 0x246   :  { %899 = vsyncadd [#allocation4], 4294967168 }
 0x247   :  { %564 = vsyncpa [#allocation3], 1 }
 0x248   :  { %565 = vsyncpa [#allocation6], 1 }
 0x249   :  { %566 = vsyncpa [#allocation4], 1 }

</bundles_post_ra>
